<compile_context>
chip_gen: v6e
topology: v6e:2x2x1
jax: 0.10.0
libtpu: 0.0.40
codegen_flags: <defaults>
</compile_context>

<pallas_src>
import functools

import jax
import jax.numpy as jnp
from jax import lax
from jax.experimental import pallas as pl
from jax.experimental.pallas import tpu as pltpu


def _attention_head_kernel(xq_ref, xkv_ref, wq_ref, bq_ref, wk_ref, bk_ref,
                           wv_ref, bv_ref, mask_ref, out_ref, attn_ref, *,
                           mxu_dtype):
    # xq_ref:  (tq, D)  query rows of the current (batch, q-tile) grid step
    # xkv_ref: (S,  D)  all rows of the current batch (for K and V)
    # w*_ref:  (D, Di) / (D, D) weights in mxu_dtype; softmax scale folded in WQ
    # b*_ref:  (1, Di) / (1, D) f32 biases (scale folded in bQ)
    # mask_ref:(1, S)   additive mask bias (0 keep / -1e30 masked)
    f32 = jnp.float32

    # Projections: MXU matmuls in mxu_dtype, f32 accumulation, f32 bias add.
    q = jnp.dot(xq_ref[...], wq_ref[...], preferred_element_type=f32) + bq_ref[...]
    k = jnp.dot(xkv_ref[...], wk_ref[...], preferred_element_type=f32) + bk_ref[...]
    v = jnp.dot(xkv_ref[...], wv_ref[...], preferred_element_type=f32) + bv_ref[...]

    # scores = Q @ K^T (scale already folded into WQ/bQ); contract the last dims
    # directly so no explicit K transpose is materialized.
    # TODO(synk): confirm via pl.lower_as_mlir that Mosaic emits no per-step
    # vxpose of K at scaled (S, Di) shapes (review item).
    scores = lax.dot_general(
        q.astype(mxu_dtype), k.astype(mxu_dtype),
        dimension_numbers=(((1,), (1,)), ((), ())),
        preferred_element_type=f32,
    )
    scores = scores + mask_ref[...]                     # (tq, S) + (1, S)

    # Numerically stable softmax, strictly f32 (VPU max/sum, EUP exp).
    m = jnp.max(scores, axis=-1, keepdims=True)
    e = jnp.exp(scores - m)
    denom = jnp.sum(e, axis=-1, keepdims=True)
    a = e / denom            # exact division: returned attention rows sum to 1

    out = jnp.dot(a.astype(mxu_dtype), v.astype(mxu_dtype),
                  preferred_element_type=f32)

    attn_ref[...] = a.astype(attn_ref.dtype)
    out_ref[...] = out.astype(out_ref.dtype)


def _pick_q_tile(seq):
    # Prefer MXU-friendly 256 (v6e/v7x) then 128 (also fine on v5e); otherwise
    # the sequence is small enough to take whole.
    for t in (256, 128):
        if seq % t == 0:
            return t
    return seq


def attention_head(x, wq, bq, wk, bk, wv, bv, mask=None, *,
                   mxu_dtype=jnp.bfloat16, attn_dtype=jnp.float32):
    """Single self-attention head == PyTorch AttentionHead.forward.

    x: (B, S, d_model). Weights are (in, out), biases (1, out).
    mask: optional (B, S); keys where mask == 0 are excluded
    (masked_fill(mask == 0, -inf) semantics). Returns (Afinal, A).
    """
    B, S, D = x.shape
    Di = wq.shape[1]
    scale = 1.0 / (D ** 0.5)     # module: self.WQ.in_features ** 0.5 == sqrt(d_model)

    tq = _pick_q_tile(S)
    q_blocks = S // tq

    # Fold the softmax scale into WQ/bQ and pre-cast MXU operands so both HBM
    # traffic and MXU feed are narrow. Biases stay f32 (post-accumulation add).
    wq_s = (wq * scale).astype(mxu_dtype)
    wk_m = wk.astype(mxu_dtype)
    wv_m = wv.astype(mxu_dtype)
    bq_s = (bq * scale).astype(jnp.float32)
    bk_f = bk.astype(jnp.float32)
    bv_f = bv.astype(jnp.float32)
    x_m = x.astype(mxu_dtype)

    # Additive mask bias: exp underflows to exactly 0 for masked keys.
    if mask is None:
        mask_bias = jnp.zeros((B, 1, S), jnp.float32)
    else:
        mask_bias = jnp.where(mask == 0, -1e30, 0.0).astype(jnp.float32).reshape(B, 1, S)

    kernel = functools.partial(_attention_head_kernel, mxu_dtype=mxu_dtype)

    in_specs = [
        pl.BlockSpec((None, tq, D), lambda b, qi: (b, qi, 0)),   # x, query rows
        pl.BlockSpec((None, S, D), lambda b, qi: (b, 0, 0)),     # x, key/value rows
        pl.BlockSpec((D, Di), lambda b, qi: (0, 0)),             # WQ (scaled)
        pl.BlockSpec((1, Di), lambda b, qi: (0, 0)),             # bQ (scaled)
        pl.BlockSpec((D, Di), lambda b, qi: (0, 0)),             # WK
        pl.BlockSpec((1, Di), lambda b, qi: (0, 0)),             # bK
        pl.BlockSpec((D, D), lambda b, qi: (0, 0)),              # WV
        pl.BlockSpec((1, D), lambda b, qi: (0, 0)),              # bV
        pl.BlockSpec((None, 1, S), lambda b, qi: (b, 0, 0)),     # mask bias
    ]
    out_specs = (
        pl.BlockSpec((None, tq, D), lambda b, qi: (b, qi, 0)),   # Afinal
        pl.BlockSpec((None, tq, S), lambda b, qi: (b, qi, 0)),   # A
    )

    # Per-step VMEM sizing (double-buffered tiles + resident weights) with a
    # generous safety factor, clamped so it fits v7x's 64 MiB physical VMEM.
    mxu_b = jnp.dtype(mxu_dtype).itemsize
    attn_b = jnp.dtype(attn_dtype).itemsize
    step_bytes = (2 * (tq * D + S * D) * mxu_b                    # x tiles (2-deep)
                  + (2 * D * Di + D * D) * mxu_b                  # weights, resident
                  + (2 * Di + D + S) * 4                          # biases + mask row
                  + 2 * (tq * D * 4 + tq * S * attn_b))           # outputs (2-deep)
    vmem_limit = int(min(48 * 1024 * 1024, max(16 * 1024 * 1024, 4 * step_bytes)))

    flops = int(2 * B * S * D * Di                       # Q projection
                + 2 * B * q_blocks * S * D * (Di + D)    # K/V projections (per q-tile)
                + 2 * B * S * S * (Di + D))              # Q@K^T and A@V
    transcendentals = int(B * S * S)                     # exp per score
    bytes_accessed = int(B * S * D * mxu_b * (1 + q_blocks)
                         + (2 * D * Di + D * D) * mxu_b
                         + (2 * Di + D) * 4 + B * S * 4
                         + B * S * D * 4 + B * S * S * attn_b)

    out, attn = pl.pallas_call(
        kernel,
        out_shape=(
            jax.ShapeDtypeStruct((B, S, D), x.dtype),
            jax.ShapeDtypeStruct((B, S, S), attn_dtype),
        ),
        grid_spec=pl.GridSpec(grid=(B, q_blocks), in_specs=in_specs,
                              out_specs=out_specs),
        compiler_params=pltpu.CompilerParams(
            dimension_semantics=("parallel", "parallel"),
            vmem_limit_bytes=vmem_limit,
        ),
        cost_estimate=pl.CostEstimate(flops=flops,
                                      transcendentals=transcendentals,
                                      bytes_accessed=bytes_accessed),
    )(x_m, x_m, wq_s, bq_s, wk_m, bk_f, wv_m, bv_f, mask_bias)
    return out, attn


def _reference(x, wq, bq, wk, bk, wv, bv, mask=None):
    D = x.shape[-1]
    hp = lax.Precision.HIGHEST
    q = jnp.dot(x, wq, precision=hp) + bq
    k = jnp.dot(x, wk, precision=hp) + bk
    v = jnp.dot(x, wv, precision=hp) + bv
    s = jnp.einsum("bqd,bkd->bqk", q, k, precision=hp) / (D ** 0.5)
    if mask is not None:
        s = jnp.where((mask == 0)[:, None, :], -jnp.inf, s)
    a = jax.nn.softmax(s, axis=-1)
    out = jnp.einsum("bqk,bkd->bqd", a, v, precision=hp)
    return out, a


if __name__ == "__main__":
    B, S, d_model, d_internal = 2, 8, 32, 16

    key = jax.random.PRNGKey(0)
    kx, k1, k2, k3, k4, k5, k6, km = jax.random.split(key, 8)

    x = jax.random.normal(kx, (B, S, d_model), dtype=jnp.float32)

    # Deterministic nn.Linear-like uniform init, stored as (in, out).
    bound = 1.0 / (d_model ** 0.5)
    wq = jax.random.uniform(k1, (d_model, d_internal), jnp.float32, -bound, bound)
    bq = jax.random.uniform(k2, (1, d_internal), jnp.float32, -bound, bound)
    wk = jax.random.uniform(k3, (d_model, d_internal), jnp.float32, -bound, bound)
    bk = jax.random.uniform(k4, (1, d_internal), jnp.float32, -bound, bound)
    wv = jax.random.uniform(k5, (d_model, d_model), jnp.float32, -bound, bound)
    bv = jax.random.uniform(k6, (1, d_model), jnp.float32, -bound, bound)

    # 1) f32-MXU path, no mask: tight check against the f32 reference.
    out_f32, attn_f32 = attention_head(x, wq, bq, wk, bk, wv, bv,
                                       mxu_dtype=jnp.float32)
    jax.block_until_ready((out_f32, attn_f32))
    ref_out, ref_attn = _reference(x, wq, bq, wk, bk, wv, bv)
    assert jnp.allclose(out_f32, ref_out, atol=1e-4, rtol=1e-4)
    assert jnp.allclose(attn_f32, ref_attn, atol=1e-4, rtol=1e-4)

    # 2) f32-MXU path with a key mask (masked_fill(-inf) semantics).
    mask = (jax.random.uniform(km, (B, S)) > 0.3).astype(jnp.int32)
    mask = mask.at[:, 0].set(1)   # keep at least one unmasked key per batch
    out_m, attn_m = attention_head(x, wq, bq, wk, bk, wv, bv, mask,
                                   mxu_dtype=jnp.float32)
    jax.block_until_ready((out_m, attn_m))
    ref_out_m, ref_attn_m = _reference(x, wq, bq, wk, bk, wv, bv, mask)
    assert jnp.allclose(out_m, ref_out_m, atol=1e-4, rtol=1e-4)
    assert jnp.allclose(attn_m, ref_attn_m, atol=1e-4, rtol=1e-4)

    # 3) Default bf16-MXU / f32-accumulate path (the performance configuration).
    out_bf, attn_bf = attention_head(x, wq, bq, wk, bk, wv, bv)
    jax.block_until_ready((out_bf, attn_bf))
    assert jnp.allclose(out_bf, ref_out, atol=3e-2, rtol=3e-2)
    assert jnp.allclose(attn_bf, ref_attn, atol=3e-2, rtol=3e-2)

    print("KERNEL_OK")
</pallas_src>

<mosaic_0001>
module attributes {stable_mosaic.version = 11 : i64} {
  func.func @_attention_head_kernel(%arg0: i32, %arg1: i32, %arg2: memref<1x8x32xf32, #tpu.memory_space<vmem>>, %arg3: memref<1x8x32xf32, #tpu.memory_space<vmem>>, %arg4: memref<32x16xf32, #tpu.memory_space<vmem>>, %arg5: memref<1x16xf32, #tpu.memory_space<vmem>>, %arg6: memref<32x16xf32, #tpu.memory_space<vmem>>, %arg7: memref<1x16xf32, #tpu.memory_space<vmem>>, %arg8: memref<32x32xf32, #tpu.memory_space<vmem>>, %arg9: memref<1x32xf32, #tpu.memory_space<vmem>>, %arg10: memref<1x1x8xf32, #tpu.memory_space<vmem>>, %arg11: memref<1x8x32xf32, #tpu.memory_space<vmem>>, %arg12: memref<1x8x8xf32, #tpu.memory_space<vmem>>) attributes {dimension_semantics = [#tpu.dimension_semantics<parallel>, #tpu.dimension_semantics<parallel>], iteration_bounds = array<i64: 2, 1>, scalar_prefetch = 0 : i64, scratch_operands = 0 : i64, tpu.core_type = #tpu.core_type<tc>, window_params = [{transform_indices = @transform_0, window_bounds = array<i64: 1, 8, 32>}, {transform_indices = @transform_1, window_bounds = array<i64: 1, 8, 32>}, {pipeline_mode = #tpu.pipeline_mode<synchronous>, transform_indices = @transform_2, window_bounds = array<i64: 32, 16>}, {pipeline_mode = #tpu.pipeline_mode<synchronous>, transform_indices = @transform_3, window_bounds = array<i64: 1, 16>}, {pipeline_mode = #tpu.pipeline_mode<synchronous>, transform_indices = @transform_4, window_bounds = array<i64: 32, 16>}, {pipeline_mode = #tpu.pipeline_mode<synchronous>, transform_indices = @transform_5, window_bounds = array<i64: 1, 16>}, {pipeline_mode = #tpu.pipeline_mode<synchronous>, transform_indices = @transform_6, window_bounds = array<i64: 32, 32>}, {pipeline_mode = #tpu.pipeline_mode<synchronous>, transform_indices = @transform_7, window_bounds = array<i64: 1, 32>}, {transform_indices = @transform_8, window_bounds = array<i64: 1, 1, 8>}, {transform_indices = @transform_9, window_bounds = array<i64: 1, 8, 32>}, {transform_indices = @transform_10, window_bounds = array<i64: 1, 8, 8>}]} {
    %c0 = arith.constant 0 : index
    %c0_0 = arith.constant 0 : index
    %c0_1 = arith.constant 0 : index
    %0 = vector.load %arg2[%c0, %c0_0, %c0_1] : memref<1x8x32xf32, #tpu.memory_space<vmem>>, vector<1x8x32xf32>
    %1 = vector.shape_cast %0 : vector<1x8x32xf32> to vector<8x32xf32>
    %c0_2 = arith.constant 0 : index
    %c0_3 = arith.constant 0 : index
    %2 = vector.load %arg4[%c0_2, %c0_3] : memref<32x16xf32, #tpu.memory_space<vmem>>, vector<32x16xf32>
    %cst = arith.constant dense<0.000000e+00> : vector<8x16xf32>
    %3 = tpu.matmul %1, %2, %cst {dimension_numbers = #tpu.dot_dimension_numbers<[1], [0], [0], [1], [0, 0, 1, 1], [], []>} : vector<8x32xf32>, vector<32x16xf32>, vector<8x16xf32> -> vector<8x16xf32>
    %c0_4 = arith.constant 0 : index
    %c0_5 = arith.constant 0 : index
    %4 = vector.load %arg5[%c0_4, %c0_5] : memref<1x16xf32, #tpu.memory_space<vmem>>, vector<1x16xf32>
    %5 = vector.broadcast %4 : vector<1x16xf32> to vector<8x16xf32>
    %6 = arith.addf %3, %5 : vector<8x16xf32>
    %c0_6 = arith.constant 0 : index
    %c0_7 = arith.constant 0 : index
    %c0_8 = arith.constant 0 : index
    %7 = vector.load %arg3[%c0_6, %c0_7, %c0_8] : memref<1x8x32xf32, #tpu.memory_space<vmem>>, vector<1x8x32xf32>
    %8 = vector.shape_cast %7 : vector<1x8x32xf32> to vector<8x32xf32>
    %c0_9 = arith.constant 0 : index
    %c0_10 = arith.constant 0 : index
    %9 = vector.load %arg6[%c0_9, %c0_10] : memref<32x16xf32, #tpu.memory_space<vmem>>, vector<32x16xf32>
    %cst_11 = arith.constant dense<0.000000e+00> : vector<8x16xf32>
    %10 = tpu.matmul %8, %9, %cst_11 {dimension_numbers = #tpu.dot_dimension_numbers<[1], [0], [0], [1], [0, 0, 1, 1], [], []>} : vector<8x32xf32>, vector<32x16xf32>, vector<8x16xf32> -> vector<8x16xf32>
    %c0_12 = arith.constant 0 : index
    %c0_13 = arith.constant 0 : index
    %11 = vector.load %arg7[%c0_12, %c0_13] : memref<1x16xf32, #tpu.memory_space<vmem>>, vector<1x16xf32>
    %12 = vector.broadcast %11 : vector<1x16xf32> to vector<8x16xf32>
    %13 = arith.addf %10, %12 : vector<8x16xf32>
    %c0_14 = arith.constant 0 : index
    %c0_15 = arith.constant 0 : index
    %c0_16 = arith.constant 0 : index
    %14 = vector.load %arg3[%c0_14, %c0_15, %c0_16] : memref<1x8x32xf32, #tpu.memory_space<vmem>>, vector<1x8x32xf32>
    %15 = vector.shape_cast %14 : vector<1x8x32xf32> to vector<8x32xf32>
    %c0_17 = arith.constant 0 : index
    %c0_18 = arith.constant 0 : index
    %16 = vector.load %arg8[%c0_17, %c0_18] : memref<32x32xf32, #tpu.memory_space<vmem>>, vector<32x32xf32>
    %cst_19 = arith.constant dense<0.000000e+00> : vector<8x32xf32>
    %17 = tpu.matmul %15, %16, %cst_19 {dimension_numbers = #tpu.dot_dimension_numbers<[1], [0], [0], [1], [0, 0, 1, 1], [], []>} : vector<8x32xf32>, vector<32x32xf32>, vector<8x32xf32> -> vector<8x32xf32>
    %c0_20 = arith.constant 0 : index
    %c0_21 = arith.constant 0 : index
    %18 = vector.load %arg9[%c0_20, %c0_21] : memref<1x32xf32, #tpu.memory_space<vmem>>, vector<1x32xf32>
    %19 = vector.broadcast %18 : vector<1x32xf32> to vector<8x32xf32>
    %20 = arith.addf %17, %19 : vector<8x32xf32>
    %cst_22 = arith.constant dense<0.000000e+00> : vector<8x8xf32>
    %21 = tpu.matmul %6, %13, %cst_22 {dimension_numbers = #tpu.dot_dimension_numbers<[1], [1], [0], [0], [0, 0, 1, 0], [], []>} : vector<8x16xf32>, vector<8x16xf32>, vector<8x8xf32> -> vector<8x8xf32>
    %c0_23 = arith.constant 0 : index
    %c0_24 = arith.constant 0 : index
    %c0_25 = arith.constant 0 : index
    %22 = vector.load %arg10[%c0_23, %c0_24, %c0_25] : memref<1x1x8xf32, #tpu.memory_space<vmem>>, vector<1x1x8xf32>
    %23 = vector.shape_cast %22 : vector<1x1x8xf32> to vector<1x8xf32>
    %24 = vector.broadcast %23 : vector<1x8xf32> to vector<8x8xf32>
    %25 = arith.addf %21, %24 : vector<8x8xf32>
    %cst_26 = arith.constant dense<0xFF800000> : vector<8xf32>
    %26 = vector.multi_reduction <maximumf>, %25, %cst_26 [1] : vector<8x8xf32> to vector<8xf32>
    %27 = vector.shape_cast %26 : vector<8xf32> to vector<8x1xf32>
    %28 = vector.broadcast %27 : vector<8x1xf32> to vector<8x8xf32>
    %29 = arith.subf %25, %28 : vector<8x8xf32>
    %30 = math.exp %29 : vector<8x8xf32>
    %cst_27 = arith.constant dense<0.000000e+00> : vector<8xf32>
    %31 = vector.multi_reduction <add>, %30, %cst_27 [1] : vector<8x8xf32> to vector<8xf32>
    %32 = vector.shape_cast %31 : vector<8xf32> to vector<8x1xf32>
    %33 = vector.broadcast %32 : vector<8x1xf32> to vector<8x8xf32>
    %34 = arith.divf %30, %33 : vector<8x8xf32>
    %cst_28 = arith.constant dense<0.000000e+00> : vector<8x32xf32>
    %35 = tpu.matmul %34, %20, %cst_28 {dimension_numbers = #tpu.dot_dimension_numbers<[1], [0], [0], [1], [0, 0, 1, 1], [], []>} : vector<8x8xf32>, vector<8x32xf32>, vector<8x32xf32> -> vector<8x32xf32>
    %c0_29 = arith.constant 0 : index
    %c0_30 = arith.constant 0 : index
    %c0_31 = arith.constant 0 : index
    %36 = vector.load %arg12[%c0_29, %c0_30, %c0_31] : memref<1x8x8xf32, #tpu.memory_space<vmem>>, vector<1x8x8xf32>
    %37 = vector.shape_cast %36 : vector<1x8x8xf32> to vector<8x8xf32>
    %38 = vector.shape_cast %34 : vector<8x8xf32> to vector<1x8x8xf32>
    tpu.vector_store %arg12[%c0_29, %c0_30, %c0_31], %38 {strides = array<i32>} : memref<1x8x8xf32, #tpu.memory_space<vmem>>, vector<1x8x8xf32>,
    %c0_32 = arith.constant 0 : index
    %c0_33 = arith.constant 0 : index
    %c0_34 = arith.constant 0 : index
    %39 = vector.load %arg11[%c0_32, %c0_33, %c0_34] : memref<1x8x32xf32, #tpu.memory_space<vmem>>, vector<1x8x32xf32>
    %40 = vector.shape_cast %39 : vector<1x8x32xf32> to vector<8x32xf32>
    %41 = vector.shape_cast %35 : vector<8x32xf32> to vector<1x8x32xf32>
    tpu.vector_store %arg11[%c0_32, %c0_33, %c0_34], %41 {strides = array<i32>} : memref<1x8x32xf32, #tpu.memory_space<vmem>>, vector<1x8x32xf32>,
    return
  }
  func.func @transform_0(%arg0: i32, %arg1: i32) -> (i32, i32, i32) {
    %c0_i32 = arith.constant 0 : i32
    %c0_i32_0 = arith.constant 0 : i32
    return %arg0, %arg1, %c0_i32 : i32, i32, i32
  }
  func.func @transform_1(%arg0: i32, %arg1: i32) -> (i32, i32, i32) {
    %c0_i32 = arith.constant 0 : i32
    %c0_i32_0 = arith.constant 0 : i32
    %c0_i32_1 = arith.constant 0 : i32
    return %arg0, %c0_i32, %c0_i32_0 : i32, i32, i32
  }
  func.func @transform_2(%arg0: i32, %arg1: i32) -> (i32, i32) {
    %c0_i32 = arith.constant 0 : i32
    %c0_i32_0 = arith.constant 0 : i32
    %c0_i32_1 = arith.constant 0 : i32
    return %c0_i32, %c0_i32_0 : i32, i32
  }
  func.func @transform_3(%arg0: i32, %arg1: i32) -> (i32, i32) {
    %c0_i32 = arith.constant 0 : i32
    %c0_i32_0 = arith.constant 0 : i32
    %c0_i32_1 = arith.constant 0 : i32
    return %c0_i32, %c0_i32_0 : i32, i32
  }
  func.func @transform_4(%arg0: i32, %arg1: i32) -> (i32, i32) {
    %c0_i32 = arith.constant 0 : i32
    %c0_i32_0 = arith.constant 0 : i32
    %c0_i32_1 = arith.constant 0 : i32
    return %c0_i32, %c0_i32_0 : i32, i32
  }
  func.func @transform_5(%arg0: i32, %arg1: i32) -> (i32, i32) {
    %c0_i32 = arith.constant 0 : i32
    %c0_i32_0 = arith.constant 0 : i32
    %c0_i32_1 = arith.constant 0 : i32
    return %c0_i32, %c0_i32_0 : i32, i32
  }
  func.func @transform_6(%arg0: i32, %arg1: i32) -> (i32, i32) {
    %c0_i32 = arith.constant 0 : i32
    %c0_i32_0 = arith.constant 0 : i32
    %c0_i32_1 = arith.constant 0 : i32
    return %c0_i32, %c0_i32_0 : i32, i32
  }
  func.func @transform_7(%arg0: i32, %arg1: i32) -> (i32, i32) {
    %c0_i32 = arith.constant 0 : i32
    %c0_i32_0 = arith.constant 0 : i32
    %c0_i32_1 = arith.constant 0 : i32
    return %c0_i32, %c0_i32_0 : i32, i32
  }
  func.func @transform_8(%arg0: i32, %arg1: i32) -> (i32, i32, i32) {
    %c0_i32 = arith.constant 0 : i32
    %c0_i32_0 = arith.constant 0 : i32
    %c0_i32_1 = arith.constant 0 : i32
    return %arg0, %c0_i32, %c0_i32_0 : i32, i32, i32
  }
  func.func @transform_9(%arg0: i32, %arg1: i32) -> (i32, i32, i32) {
    %c0_i32 = arith.constant 0 : i32
    %c0_i32_0 = arith.constant 0 : i32
    return %arg0, %arg1, %c0_i32 : i32, i32, i32
  }
  func.func @transform_10(%arg0: i32, %arg1: i32) -> (i32, i32, i32) {
    %c0_i32 = arith.constant 0 : i32
    %c0_i32_0 = arith.constant 0 : i32
    return %arg0, %arg1, %c0_i32 : i32, i32, i32
  }
}

</mosaic_0001>

<bundles_post_ra>
// kernel: tpu_custom_call.1
= control target key start
LH: loop header
LB: loop body
LE: loop exit
PB: predicated region body
PF: predicated region fallthrough
CT: control target
= control target key end

     0   :  { %s1533_s0 = inlined_call_operand.vmem [shape: f32[2,8,32], index: 0, kind: input, shape index: {}]   ;;  %s1534_s1 = inlined_call_operand.vmem [shape: f32[2,8,32], index: 1, kind: input, shape index: {}]   ;;  %s1535_s2 = inlined_call_operand.vmem [shape: f32[32,16], index: 2, kind: input, shape index: {}]   ;;  %s1536_s3 = inlined_call_operand.vmem [shape: f32[1,16], index: 3, kind: input, shape index: {}]   ;;  %s1537_s4 = inlined_call_operand.vmem [shape: f32[32,16], index: 4, kind: input, shape index: {}]   ;;  %s1538_s5 = inlined_call_operand.vmem [shape: f32[1,16], index: 5, kind: input, shape index: {}]   ;;  %s1539_s6 = inlined_call_operand.vmem [shape: f32[32,32], index: 6, kind: input, shape index: {}]   ;;  %s1540_s7 = inlined_call_operand.vmem [shape: f32[1,32], index: 7, kind: input, shape index: {}]   ;;  %s1541_s8 = inlined_call_operand.vmem [shape: f32[2,1,8], index: 8, kind: input, shape index: {}]   ;;  %s1542_s9 = inlined_call_operand.hbm [shape: f32[2,8,32], index: 9, kind: output, shape index: {0}]   ;;  %s1543_s10 = inlined_call_operand.hbm [shape: f32[2,8,8], index: 10, kind: output, shape index: {1}]  }
   0x1   :  { %1548 = sst [smem:[#allocation10_spill]] %s1533_s0 }
   0x2   :  { %1549 = sst [smem:[#allocation11_spill]] %s1534_s1 }
   0x3   :  { %16 = vsyncpa [#allocation3], 0 }
   0x4   :  { %18 = vsyncpa [#allocation3 + $0x1], 0 }
   0x5   :  { %19 = vsyncpa [#allocation5], 0 }
   0x6   :  { %21 = vsyncpa [#allocation5 + $0x1], 0  ;;  %s1326_s13 = smov 0   ;;  %s1328_s14 = smov 0  }
   0x7   :  { %s1330_s15 = smov 0   ;;  %s1332_s16 = smov 0  }
   0x8   :  { %s1334_s17 = smov 0   ;;  %s1336_s18 = smov 0  }
   0x9 LB: > { %1550 = sst [smem:[#allocation8_spill]] %s1261_s17  ;;  %s1006_s19 = sadd.s32 4294967295, %s1265_s18   ;;  %s1265_s18 = sphi %s1336_s18, %s27_s18   ;;  %s1261_s17 = sphi %s1334_s17, %s1559_s17   ;;  %s1257_s16 = sphi %s1332_s16, %s1558_s16   ;;  %s1253_s15 = sphi %s1330_s15, %s1562_s15   ;;  %s1249_s14 = sphi %s1328_s14, %s1561_s14   ;;  %s1245_s13 = sphi %s1326_s13, %s1560_s13  }
   0xa   : > { %s1007_s20 = sadd.s32 4294967294, %s1265_s18   ;;  %s39_s21 = sadd.s32 1, %s1261_s17 }
   0xb   : > { %s254_s22 = sadd.s32 1, %s1253_s15  ;;  %p41_p0 = scmp.ge.s32.totalorder %s39_s21, 2 }
   0xc   : > { %p264_p1 = scmp.ne.s32.totalorder %s1253_s15, %s1249_s14  ;;  %p265_p2 = scmp.eq.s32.totalorder %s1006_s19, 1 }
   0xd   : > { %p270_p3 = scmp.ne.s32.totalorder %s1249_s14, %s1245_s13  ;;  %s1564_s21 = smov (%p41_p0, %s39_s21), 0 }
   0xe   : > { %1551 = sst [smem:[#allocation9_spill]] %s1564_s21  ;;  %p1366_p4 = por %p265_p2, %p264_p1 }
   0xf   : > { %p271_p5 = scmp.eq.s32.totalorder %s1007_s20, 1  ;;  %s249_s24 = ssub.s32 %s1261_s17, %s1564_s21 }
  0x10   : > { %p1010_p6 = scmp.ge.s32.totalorder %s1265_s18, 1  ;;  %p252_p7 = scmp.eq.s32.totalorder %s249_s24, 0 }
  0x11   : > { %p1373_p8 = por %p271_p5, %p270_p3  ;;  %p358_p9 = scmp.lt.s32.totalorder %s1265_s18, 3 }
  0x12   : > { %s1379_s26 = scalar_select %p252_p7, %s1253_s15, %s254_s22  }
  0x13   : > { %p359_p10 = pnand %p1010_p6, %p358_p9 }
  0x14   : > { %p410_p11 = scmp.lt.s32.totalorder (!%p359_p10), %s1257_s16, 1  ;;  %s1554_s1 = sld [smem:[#allocation11_spill]] (!%p359_p10) }
  0x15   : > { %362 = sbr.rel (%p359_p10) target bundleno = 947 (0x3b3), region = 56  ;;  %s1555_s0 = sld [smem:[#allocation10_spill]] (!%p359_p10) }
  0x16   : > { %s1452_s19 = sand.u32 (!%p359_p10), 1, %s1249_s14   ;;  %s1269_s12 = smov (!%p359_p10), [#allocation4]  }
  0x17   : > { %s1546_s20 = sshll.u32 (!%p359_p10), %s1452_s19, 3 }
  0x18   : > { %s409_s24 = scalar_lea.vmem (!%p359_p10), [#allocation4], %s1546_s20 }
  0x1a   : > { %v514_v0 = vld [vmem:[%s1537_s4 + $0x18] sm:$0xff]  ;;  %v1267_v2 = vmov 0.0   ;;  %v513_v3 = vld [vmem:[%s1537_s4 + $0x10] sm:$0xff]  ;;  %s1395_s22 = scalar_select %p410_p11, %s1257_s16, 1  ;;  %v512_v5 = vld [vmem:[%s1537_s4 + $0x8] sm:$0xff]  ;;  %vm436_vm0 = vcmask 261120  }
  0x1b   : > { %v428_v1 = vld [vmem:[%s1535_s2 + $0x18] sm:$0xff]  ;;  %1061 = vmatprep.subr.mxu1 %v1267_v2  ;;  %1050 = vmatprep.subr.mxu0 %v1267_v2  ;;  %v427_v4 = vld [vmem:[%s1535_s2 + $0x10] sm:$0xff]  ;;  %v426_v6 = vld [vmem:[%s1535_s2 + $0x8] sm:$0xff]  ;;  %vm1268_vm1 = vmmov 0   ;;  %vm683_vm2 = vcmask 130048   ;;  %vm760_vm3 = vcmask 64512  }
  0x1c   : > { %1062 = vmatpush3.msra.mxu1 %v514_v0  ;;  %1051 = vmatpush3.msra.mxu0 %v428_v1  ;;  %s1013_s30 = sshll.u32 %s1395_s22, 3  ;;  %v511_v7 = vld [vmem:[%s1537_s4] sm:$0xff]  ;;  %v598_v19 = vld [vmem:[%s1539_s6 + $0x18] sm:$0xff]  ;;  %v597_v20 = vld [vmem:[%s1539_s6 + $0x10] sm:$0xff]  ;;  %s423_s11 = scalar_lea.vmem %s1541_s8, %s1395_s22 }
  0x1d   : > { %1063 = vmatprep.subr.mxu1 %v1267_v2  ;;  %1052 = vmatprep.subr.mxu0 %v1267_v2  ;;  %s420_s21 = scalar_lea.vmem %s1554_s1, %s1013_s30  ;;  %s416_s27 = scalar_lea.vmem %s1555_s0, %s1013_s30  ;;  %v425_v9 = vld [vmem:[%s1535_s2] sm:$0xff]  ;;  %v596_v21 = vld [vmem:[%s1539_s6 + $0x8] sm:$0xff] }
  0x1e   : > { %1064 = vmatpush3.msra.mxu1 %v513_v3  ;;  %1053 = vmatpush3.msra.mxu0 %v427_v4  ;;  %v510_v8 = vld [vmem:[%s420_s21] sm:$0xff]  ;;  %s881_s21 = sshll.u32 %s409_s24, 4  ;;  %s853_s30 = scalar_lea.sflag [#allocation5], %s1452_s19  ;;  %s882_s21 = int_to_ptr.vmem [resolvable:$true] %s881_s21 }
  0x1f   : > { %1065 = vmatprep.subr.mxu1 %v1267_v2  ;;  %1054 = vmatprep.subr.mxu0 %v1267_v2  ;;  %v424_v10 = vld [vmem:[%s416_s27] sm:$0xff]  ;;  %s1547_s27 = sshll.u32 %s1257_s16, 7  ;;  %s1163_s22 = sshll.u32 %s1269_s12, 4  ;;  %s1164_s22 = int_to_ptr.vmem [resolvable:$false] %s1163_s22 }
  0x20   : > { %1066 = vmatpush3.msra.mxu1 %v512_v5  ;;  %1055 = vmatpush3.msra.mxu0 %v426_v6  ;;  %v1017_v11 = vld [vmem:[%s1538_s5] ss:$0 sm:$0xff]  ;;  %s879_s17 = scalar_lea.hbm %s1543_s10, %s1547_s27  ;;  %s1165_s20 = scalar_lea.vmem %s1164_s22, 256 }
  0x21   : > { %1067 = vmatprep.subr.mxu1 %v1267_v2  ;;  %1069 = vmatprep.mubr.msk.f32.mxu1 %vm1268_vm1, %v1267_v2  ;;  %v1015_v13 = vld [vmem:[%s1536_s3] ss:$0 sm:$0xff]  ;;  %p1166_p1 = scmp.lt.s32.totalorder %s882_s21, %s1164_s22 }
  0x22   : > { %1068 = vmatpush3.msra.mxu1 %v511_v7  ;;  %1056 = vmatprep.subr.mxu0 %v1267_v2  ;;  %v595_v22 = vld [vmem:[%s1539_s6] sm:$0xff] }
  0x23   : > { %1070 = vmatmul.mubr.msk.f32.vlgmr.msra.gmra.mxu1 %vm436_vm0, %v510_v8  ;;  %1057 = vmatpush3.msra.mxu0 %v425_v9  ;;  %v1021_v23 = vld [vmem:[%s423_s11] ss:$0 sm:$0xff]  ;;  %s1159_s11 = scalar_lea.vmem %s882_s21, 128 }
  0x24   : > { %1058 = vmatprep.mubr.msk.f32.mxu0 %vm1268_vm1, %v1267_v2  ;;  %1083 = vmatprep.subr.mxu1 %v1267_v2  ;;  %v1019_v33 = vld [vmem:[%s1540_s7] ss:$0 sm:$0xff]  ;;  %p1160_p12 = scmp.ne.s32.totalorder %s882_s21, %s1159_s11  ;;  %p1167_p2 = scmp.lt.s32.totalorder %s1165_s20, %s1159_s11 }
  0x25   : > { %1059 = vmatmul.mubr.msk.f32.vlgmr.msra.gmra.mxu0 %vm436_vm0, %v424_v10  ;;  %1085 = vmatprep.mubr.msk.f32.mxu1 %vm1268_vm1, %v1267_v2 }
  0x26   : > { %1072 = vmatprep.subr.mxu0 %v1267_v2  ;;  %1080 = vmatprep.mubr.msk.f32.mxu0 %vm1268_vm1, %v1267_v2  ;;  %p1161_p13 = pnand %p1160_p12, %p1366_p4  ;;  %p1168_p3 = por %p1167_p2, %p1166_p1 }
  0x27   : > { %1073 = vmatpush3.msra.mxu0 %v598_v19 }
  0x28   : > { %1074 = vmatprep.subr.mxu0 %v1267_v2  ;;  %p1162_p0 = pneg %p1161_p13 }
  0x29   : > { %1075 = vmatpush3.msra.mxu0 %v597_v20 }
  0x2a   : > { %1076 = vmatprep.subr.mxu0 %v1267_v2  ;;  %p1169_p5 = pnand %p1168_p3, %p1162_p0 }
  0x2b   : > { %1077 = vmatpush3.msra.mxu0 %v596_v21 }
  0x2c   : > { %1078 = vmatprep.subr.mxu0 %v1267_v2 }
  0x2d   : > { %1079 = vmatpush3.msra.mxu0 %v595_v22 }
  0x2e   : > { %1081 = vmatmul.mubr.msk.f32.vlgmr.msra.gmra.mxu0 %vm436_vm0, %v510_v8 }
  0xe3   : > { %v591_v12 = vpop.f32.mrf.mxu1 }
  0xe4   : > { %v592_v14 = vadd.f32 %v1017_v11, %v591_v12 }
  0xe5   : > { %v506_v15 = vpop.f32.mrf.mxu0  ;;  %v1071_v16 = vpop.f32.mrf.mxu1 }
  0xe6   : > { %v507_v17 = vadd.f32 %v1015_v13, %v506_v15  ;;  %1084 = vmatpush3.xpose.msk.msra.mxu1 %vm683_vm2, %v592_v14 }
  0xe7   : > { %v1060_v18 = vpop.f32.mrf.mxu0  ;;  %1088 = vmatprep.subr.mxu1 %v1267_v2 }
  0xe9   : > { %1086 = vmatmul.mubr.msk.f32.vlgmr.msra.gmra.mxu1 %vm683_vm2, %v507_v17 }
  0xea   : > { %1090 = vmatprep.mubr.msk.f32.mxu1 %vm1268_vm1, %v1267_v2 }
  0xee   : > { %v672_v34 = vpop.f32.mrf.mxu0 }
  0xef   : > { %v673_v35 = vadd.f32 %v1019_v33, %v672_v34 }
  0xf0   : > { %v1082_v36 = vpop.f32.mrf.mxu0 }
  0xf1   : > { %1089 = vmatpush3.msra.mxu1 %v673_v35 }
 0x1a9   : > { %v756_v24 = vpop.f32.mrf.mxu1 }
 0x1aa   : > { %v757_v25 = vadd.f32 %v1021_v23, %v756_v24 }
 0x1ab   : > { %v1087_v26 = vpop.f32.mrf.mxu1 }
 0x1ac   : > { %v761_v27 = vsel %vm760_vm3, %v757_v25, -inf }
 0x1ad   : > { %762 = vmax.xlane.f32.xlu0 %v761_v27 }
 0x236   : > { %v763_v28 = vpop.xlane.xlu0 %762 }
 0x237   : > { %v764_v29 = vsub.f32 %v757_v25, %v763_v28 }
 0x239   : > { %v765_v30 = vmul.f32 1.442695, %v764_v29 }
 0x23b   : > { %1155 = vpow2.f32 %v765_v30 }
 0x248   : > { %v1156_v31 = vpop.eup %1155 }
 0x249   : > { %v767_v32 = vsel %vm760_vm3, %v1156_v31, 0.0 }
 0x24a   : > { %768 = vadd.xlane.f32.xlu0 %v767_v32 }
 0x2d3   : > { %v769_v37 = vpop.xlane.xlu0 %768 }
 0x2d4   : > { %1157 = vrcp.f32 %v769_v37 }
 0x2e1   : > { %v1158_v38 = vpop.eup %1157 }
 0x2e2   : > { %v771_v39 = vmul.f32 %v1158_v38, %v1156_v31 }
 0x2e4   : > { %1091 = vmatmul.mubr.msk.f32.vlgmr.msra.gmra.mxu1 %vm760_vm3, %v771_v39  ;;  %845 = vst.msk [vmem:[%s409_s24] sm:$0xff] %vm760_vm3, %v771_v39 }
 0x2e5   : > { %1172 = shalt.err (!%p1169_p5)
}
 0x2e6   : > { %s1173_s0 = scalar_lea.hbm %s879_s17, 128  ;;  %s1177_s29 = scalar_lea.hbm %s1543_s10, 256 }
 0x2e7   : > { %p1174_p6 = scmp.ne.s32.totalorder %s879_s17, %s1173_s0  ;;  %p1178_p10 = scmp.lt.s32.totalorder %s879_s17, %s1543_s10 }
 0x2e8   : > { %p1179_p11 = scmp.lt.s32.totalorder %s1177_s29, %s1173_s0 }
 0x2e9   : > { %p1175_p7 = pnand %p1174_p6, %p1366_p4 }
 0x2ea   : > { %p1180_p12 = por %p1179_p11, %p1178_p10 }
 0x2eb   : > { %p1176_p9 = pneg %p1175_p7 }
 0x2ed   : > { %p1181_p13 = pnand %p1180_p12, %p1176_p9 }
 0x2ef   : > { %1184 = shalt.err (!%p1181_p13)
}
 0x2f0   : > { %1094 = dma.vmem_to_hbm [thread:$0]  (%p1366_p4), %s882_s21, 128, %s879_s17, %s853_s30  }
 0x2f1   : > { %s1556_s20 = sshll.u32 %s1452_s19, 3  ;;  %s1557_s22 = sshll.u32 %s1257_s16, 7 }
 0x2f2   : > { %s402_s11 = scalar_lea.vmem [#allocation2], %s1556_s20  ;;  %s1485_s1 = scalar_lea.hbm %s1542_s9, %s1557_s22 }
 0x2f3   : > { %s867_s12 = sshll.u32 %s402_s11, 4  ;;  %s848_s0 = scalar_lea.sflag [#allocation3], %s1452_s19  ;;  %s1487_s12 = int_to_ptr.vmem [resolvable:$true] %s867_s12 }
 0x2f4   : > { %s1185_s27 = scalar_lea.vmem %s1487_s12, 128  ;;  %s1270_s16 = smov [#allocation2]  }
 0x2f5   : > { %p1186_p0 = scmp.ne.s32.totalorder %s1487_s12, %s1185_s27  ;;  %s1189_s17 = sshll.u32 %s1270_s16, 4  ;;  %s1190_s17 = int_to_ptr.vmem [resolvable:$false] %s1189_s17 }
 0x2f6   : > { %s1191_s21 = scalar_lea.vmem %s1190_s17, 256  ;;  %p1192_p3 = scmp.lt.s32.totalorder %s1487_s12, %s1190_s17 }
 0x2f7   : > { %p1187_p1 = pnand %p1186_p0, %p1366_p4  ;;  %p1193_p5 = scmp.lt.s32.totalorder %s1191_s21, %s1185_s27 }
 0x2f9   : > { %p1188_p2 = pneg %p1187_p1  ;;  %p1194_p6 = por %p1193_p5, %p1192_p3 }
 0x2fb   : > { %p1195_p7 = pnand %p1194_p6, %p1188_p2 }
 0x3a4   : > { %v841_v40 = vpop.f32.mrf.mxu1 }
 0x3a5   : > { %846 = vst.msk [vmem:[%s402_s11] sm:$0xff] %vm436_vm0, %v841_v40 }
 0x3a6   : > { %v1092_v41 = vpop.f32.mrf.mxu1 }
 0x3a7   : > { %1198 = shalt.err (!%p1195_p7)
}
 0x3a8   : > { %s1199_s30 = scalar_lea.hbm %s1485_s1, 128  ;;  %s1203_s20 = scalar_lea.hbm %s1542_s9, 256 }
 0x3a9   : > { %p1200_p9 = scmp.ne.s32.totalorder %s1485_s1, %s1199_s30  ;;  %p1204_p12 = scmp.lt.s32.totalorder %s1485_s1, %s1542_s9 }
 0x3aa   : > { %p1205_p13 = scmp.lt.s32.totalorder %s1203_s20, %s1199_s30 }
 0x3ab   : > { %p1201_p10 = pnand %p1200_p9, %p1366_p4 }
 0x3ac   : > { %p1206_p0 = por %p1205_p13, %p1204_p12 }
 0x3ad   : > { %p1202_p11 = pneg %p1201_p10 }
 0x3af   : > { %p1207_p1 = pnand %p1206_p0, %p1202_p11 }
 0x3b1   : > { %1210 = shalt.err (!%p1207_p1)
}
 0x3b2   : > { %1093 = dma.vmem_to_hbm [thread:$0]  (%p1366_p4), %s1487_s12, 128, %s1485_s1, %s848_s0  }
 0x3b3 PF: > { %p1104_p2 = scmp.ge.s32.totalorder %s1265_s18, 2  ;;  %s893_s24 = sand.u32 1, %s1245_s13  }
 0x3b4   : > { %s894_s28 = scalar_lea.sflag [#allocation3], %s893_s24 }
 0x3b5   : > { %p1098_p3 = pnand %p1104_p2, %p1373_p8 }
 0x3b7   : > { %p1099_p5 = pneg %p1098_p3 }
 0x3b9   : > { %1236 = dma.done.wait (%p1099_p5), %s894_s28, 128  }
 0x3ba   : > { %1238 = vsyncadd (%p1099_p5), %s894_s28, 4294967168  ;;  %s903_s27 = scalar_lea.sflag [#allocation5], %s893_s24 }
 0x3bb   : > { %1240 = dma.done.wait (%p1099_p5), %s903_s27, 128  }
 0x3bc   : > { %1242 = vsyncadd (%p1099_p5), %s903_s27, 4294967168  ;;  %s27_s18 = sadd.s32 1, %s1265_s18   ;;  %s1558_s16 = sld [smem:[#allocation8_spill]] }
 0x3bd   : > { %p24_p6 = scmp.ge.s32.totalorder %s27_s18, 4   ;;  %s1559_s17 = sld [smem:[#allocation9_spill]] }
 0x3be   : > { %s1560_s13 = smov %s1249_s14  ;;  %s1561_s14 = smov %s1253_s15 }
 0x3bf   : > { %s1562_s15 = smov %s1379_s26  ;;  %26 = sbr.rel (!%p24_p6) target bundleno = 9 (0x9), region = 114 }
 0x3c4   :  { %908 = vsyncpa [#allocation3], 1 }
 0x3c5   :  { %910 = vsyncpa [#allocation3 + $0x1], 1 }
 0x3c6   :  { %911 = vsyncpa [#allocation5], 1 }
 0x3c7   :  { %913 = vsyncpa [#allocation5 + $0x1], 1 }

</bundles_post_ra>
